<compile_context>
chip_gen: v7x
topology: tpu7x:2x2x1
jax: 0.10.0
libtpu: 0.0.40
codegen_flags: <defaults>
</compile_context>

<pallas_src>
import functools

import jax
import jax.numpy as jnp
from jax import lax
from jax.experimental import pallas as pl
from jax.experimental.pallas import tpu as pltpu


def _round_up(x, m):
    return ((x + m - 1) // m) * m


# ---------------------------------------------------------------------------
# Fused kernel: SCL logits + CE(gt=0)  and  classifier head + CE(target)
# ---------------------------------------------------------------------------
def _fused_scl_kernel(q_ref, k_ref, qlab_ref, klab_ref, tgt_ref,
                      w1_ref, b1_ref, w2_ref, b2_ref, w3_ref, b3_ref,
                      loss_lab_ref, loss_cls_ref, *,
                      inv_temp, eps, num_classes):
    q = q_ref[...]                                    # (TQ, D) f32
    k = k_ref[...]                                    # (B,  D) f32

    # F.normalize(x, dim=-1) == x * rsqrt(max(sum(x^2), 1e-24)); fold 1/T into q
    q_inv = lax.rsqrt(jnp.maximum(jnp.sum(q * q, axis=-1, keepdims=True), 1e-24))
    k_inv = lax.rsqrt(jnp.maximum(jnp.sum(k * k, axis=-1, keepdims=True), 1e-24))
    q_n = (q * (q_inv * inv_temp)).astype(jnp.bfloat16)
    k_n = (k * k_inv).astype(jnp.bfloat16)

    # cosine similarity / T — contract last axes of both operands (no k.T copy)
    logits = lax.dot_general(q_n, k_n,
                             dimension_numbers=(((1,), (1,)), ((), ())),
                             preferred_element_type=jnp.float32)   # (TQ, B)

    same = qlab_ref[...] == klab_ref[...]             # (TQ,1)==(1,B) -> (TQ,B)
    pos_sum = jnp.sum(jnp.where(same, logits, 0.0), axis=1, keepdims=True)
    pos_cnt = jnp.sum(same.astype(jnp.float32), axis=1, keepdims=True)
    pos = pos_sum * pl.reciprocal(jnp.maximum(pos_cnt, eps), approx=True)
    neg = jnp.where(same, 0.0, logits)                # (TQ, B)

    # cross_entropy(cat([pos, neg], 1), gt=0) == lse([pos, neg_row]) - pos
    m = jnp.maximum(pos, jnp.max(neg, axis=1, keepdims=True))
    denom = jnp.exp(pos - m) + jnp.sum(jnp.exp(neg - m), axis=1, keepdims=True)
    loss_lab_ref[...] = m + jnp.log(denom) - pos      # (TQ, 1)

    # --- classifier head: Linear+tanh, Linear+tanh, Linear (bf16 on MXU) ----
    h = jnp.tanh(jnp.dot(q.astype(jnp.bfloat16), w1_ref[...],
                         preferred_element_type=jnp.float32) + b1_ref[...])
    h = jnp.tanh(jnp.dot(h.astype(jnp.bfloat16), w2_ref[...],
                         preferred_element_type=jnp.float32) + b2_ref[...])
    cls = jnp.dot(h.astype(jnp.bfloat16), w3_ref[...],
                  preferred_element_type=jnp.float32) + b3_ref[...]  # (TQ, Cp)

    col = lax.broadcasted_iota(jnp.int32, cls.shape, 1)
    cls = jnp.where(col < num_classes, cls, jnp.float32(-1e30))      # mask pad cols

    cm = jnp.max(cls, axis=1, keepdims=True)
    clse = cm + jnp.log(jnp.sum(jnp.exp(cls - cm), axis=1, keepdims=True))
    picked = jnp.sum(jnp.where(col == tgt_ref[...], cls, 0.0),
                     axis=1, keepdims=True)
    loss_cls_ref[...] = clse - picked                 # (TQ, 1)


# ---------------------------------------------------------------------------
# Wrapper: one pallas_call, grid over q-row tiles ("parallel")
# ---------------------------------------------------------------------------
def fused_scl_losses(q, k, q_label, k_label, target, params, *,
                     temperature, eps=1e-6):
    B, D = q.shape
    Bk = k.shape[0]
    num_classes = params["out_dim"]

    # Row tile for the parallel grid axis; k / labels / weights stay resident.
    if B >= 256 and B % 256 == 0:
        tq = 256
    elif B >= 128 and B % 128 == 0:
        tq = 128
    else:
        tq = B
    grid = (B // tq,)

    d1p = params["w1"].shape[1]
    d2p = params["w2"].shape[1]
    cp = params["w3"].shape[1]

    kernel = functools.partial(_fused_scl_kernel,
                               inv_temp=1.0 / float(temperature),
                               eps=float(eps),
                               num_classes=int(num_classes))

    loss_lab_rows, loss_cls_rows = pl.pallas_call(
        kernel,
        out_shape=(jax.ShapeDtypeStruct((B, 1), jnp.float32),
                   jax.ShapeDtypeStruct((B, 1), jnp.float32)),
        grid_spec=pltpu.PrefetchScalarGridSpec(
            num_scalar_prefetch=0,
            grid=grid,
            in_specs=[
                pl.BlockSpec((tq, D), lambda i: (i, 0)),     # q tile
                pl.BlockSpec((Bk, D), lambda i: (0, 0)),     # k (resident)
                pl.BlockSpec((tq, 1), lambda i: (i, 0)),     # q labels
                pl.BlockSpec((1, Bk), lambda i: (0, 0)),     # k labels (row)
                pl.BlockSpec((tq, 1), lambda i: (i, 0)),     # classifier target
                pl.BlockSpec((D, d1p), lambda i: (0, 0)),    # w1 (bf16, padded)
                pl.BlockSpec((1, d1p), lambda i: (0, 0)),    # b1
                pl.BlockSpec((d1p, d2p), lambda i: (0, 0)),  # w2
                pl.BlockSpec((1, d2p), lambda i: (0, 0)),    # b2
                pl.BlockSpec((d2p, cp), lambda i: (0, 0)),   # w3
                pl.BlockSpec((1, cp), lambda i: (0, 0)),     # b3
            ],
            out_specs=[
                pl.BlockSpec((tq, 1), lambda i: (i, 0)),     # per-row SCL CE
                pl.BlockSpec((tq, 1), lambda i: (i, 0)),     # per-row class CE
            ]),
        compiler_params=pltpu.CompilerParams(
            dimension_semantics=("parallel",),
            vmem_limit_bytes=64 * 1024 * 1024),
    )(q.astype(jnp.float32), k.astype(jnp.float32),
      q_label.reshape(B, 1).astype(jnp.int32),
      k_label.reshape(1, Bk).astype(jnp.int32),
      target.reshape(B, 1).astype(jnp.int32),
      params["w1"], params["b1"], params["w2"], params["b2"],
      params["w3"], params["b3"])

    # F.cross_entropy default reduction='mean' (tiny O(B) reduction in XLA).
    return jnp.mean(loss_lab_rows), jnp.mean(loss_cls_rows)


# ---------------------------------------------------------------------------
# Parameter init (matches ClassificationHead.__init__), padded + bf16 weights
# ---------------------------------------------------------------------------
def init_classifier_params(key, in_dim, out_dim):
    d1, d2 = in_dim // 4, in_dim // 16
    d1p = _round_up(max(d1, 1), 128)
    d2p = _round_up(max(d2, 1), 128)
    cp = _round_up(max(out_dim, 1), 128)
    ks = jax.random.split(key, 6)

    def xavier(k, fan_in, fan_out):
        bound = (6.0 / (fan_in + fan_out)) ** 0.5
        # stored as (in, out) so the kernel computes x @ W + b (== x @ W_pt.T + b)
        return jax.random.uniform(k, (fan_in, fan_out), jnp.float32, -bound, bound)

    def bias(k, dim):
        return jax.random.normal(k, (1, dim), jnp.float32) * 1e-6

    def pad2(w, rows, cols):
        return jnp.zeros((rows, cols), w.dtype).at[:w.shape[0], :w.shape[1]].set(w)

    w1 = pad2(xavier(ks[0], in_dim, d1), in_dim, d1p).astype(jnp.bfloat16)
    w2 = pad2(xavier(ks[2], d1, d2), d1p, d2p).astype(jnp.bfloat16)
    w3 = pad2(xavier(ks[4], d2, out_dim), d2p, cp).astype(jnp.bfloat16)
    b1 = pad2(bias(ks[1], d1), 1, d1p)      # biases stay f32 (added post-acc)
    b2 = pad2(bias(ks[3], d2), 1, d2p)
    b3 = pad2(bias(ks[5], out_dim), 1, cp)

    return {"w1": w1, "b1": b1, "w2": w2, "b2": b2, "w3": w3, "b3": b3,
            "out_dim": out_dim}


# ---------------------------------------------------------------------------
# Full forward (training path of SimCLR_Classifier_SCL)
# ---------------------------------------------------------------------------
def simclr_classifier_scl_forward(q, indices1, indices2, label, params, *,
                                  temperature=0.05, a=1.0, d=1.0,
                                  only_classifier=False, AA=False):
    del indices2  # bookkeeping only in _compute_logits; not used in the math

    # k = q.clone().detach(); fabric.all_gather on a single device == identity
    k = lax.stop_gradient(q)
    k_label = label
    target = indices1 if AA else label

    loss_label, loss_classify = fused_scl_losses(
        q, k, label, k_label, target, params, temperature=temperature)

    if only_classifier:
        loss_label = jnp.float32(0.0)

    loss = jnp.float32(a) * loss_label + jnp.float32(d) * loss_classify
    # training=True return signature
    return loss, loss_label, loss_classify, k, k_label


# ---------------------------------------------------------------------------
# Demo
# ---------------------------------------------------------------------------
if __name__ == "__main__":
    key = jax.random.PRNGKey(0)
    B = 8                 # batch
    D = 128               # opt.projection_size (divisible by 16)
    C = 8                 # opt.classifier_dim

    kq, kl, ki, kp = jax.random.split(key, 4)
    q = jax.random.normal(kq, (B, D), jnp.float32)          # encoder output stub
    label = jax.random.randint(kl, (B,), 0, C, jnp.int32)
    indices1 = jax.random.randint(ki, (B,), 0, C, jnp.int32)
    indices2 = jnp.arange(B, dtype=jnp.int32)

    params = init_classifier_params(kp, D, C)

    outs = simclr_classifier_scl_forward(
        q, indices1, indices2, label, params,
        temperature=0.05, a=1.0, d=1.0, only_classifier=False, AA=False)
    jax.block_until_ready(outs)

    loss, loss_label, loss_classify, k, k_label = outs
    assert loss.shape == () and k.shape == (B, D) and k_label.shape == (B,)
    assert bool(jnp.isfinite(loss)) and bool(jnp.isfinite(loss_label))
    assert bool(jnp.isfinite(loss_classify))
    print("KERNEL_OK")
</pallas_src>

<mosaic_0001>
module attributes {stable_mosaic.version = 11 : i64} {
  func.func @_fused_scl_kernel(%arg0: i32, %arg1: memref<8x128xf32, #tpu.memory_space<vmem>>, %arg2: memref<8x128xf32, #tpu.memory_space<vmem>>, %arg3: memref<8x1xi32, #tpu.memory_space<vmem>>, %arg4: memref<1x8xi32, #tpu.memory_space<vmem>>, %arg5: memref<8x1xi32, #tpu.memory_space<vmem>>, %arg6: memref<128x128xbf16, #tpu.memory_space<vmem>>, %arg7: memref<1x128xf32, #tpu.memory_space<vmem>>, %arg8: memref<128x128xbf16, #tpu.memory_space<vmem>>, %arg9: memref<1x128xf32, #tpu.memory_space<vmem>>, %arg10: memref<128x128xbf16, #tpu.memory_space<vmem>>, %arg11: memref<1x128xf32, #tpu.memory_space<vmem>>, %arg12: memref<8x1xf32, #tpu.memory_space<vmem>>, %arg13: memref<8x1xf32, #tpu.memory_space<vmem>>) attributes {dimension_semantics = [#tpu.dimension_semantics<parallel>], iteration_bounds = array<i64: 1>, scalar_prefetch = 0 : i64, scratch_operands = 0 : i64, tpu.core_type = #tpu.core_type<tc>, window_params = [{transform_indices = @transform_0, window_bounds = array<i64: 8, 128>}, {pipeline_mode = #tpu.pipeline_mode<synchronous>, transform_indices = @transform_1, window_bounds = array<i64: 8, 128>}, {transform_indices = @transform_2, window_bounds = array<i64: 8, 1>}, {pipeline_mode = #tpu.pipeline_mode<synchronous>, transform_indices = @transform_3, window_bounds = array<i64: 1, 8>}, {transform_indices = @transform_4, window_bounds = array<i64: 8, 1>}, {pipeline_mode = #tpu.pipeline_mode<synchronous>, transform_indices = @transform_5, window_bounds = array<i64: 128, 128>}, {pipeline_mode = #tpu.pipeline_mode<synchronous>, transform_indices = @transform_6, window_bounds = array<i64: 1, 128>}, {pipeline_mode = #tpu.pipeline_mode<synchronous>, transform_indices = @transform_7, window_bounds = array<i64: 128, 128>}, {pipeline_mode = #tpu.pipeline_mode<synchronous>, transform_indices = @transform_8, window_bounds = array<i64: 1, 128>}, {pipeline_mode = #tpu.pipeline_mode<synchronous>, transform_indices = @transform_9, window_bounds = array<i64: 128, 128>}, {pipeline_mode = #tpu.pipeline_mode<synchronous>, transform_indices = @transform_10, window_bounds = array<i64: 1, 128>}, {transform_indices = @transform_11, window_bounds = array<i64: 8, 1>}, {transform_indices = @transform_12, window_bounds = array<i64: 8, 1>}]} {
    %c0 = arith.constant 0 : index
    %c0_0 = arith.constant 0 : index
    %0 = vector.load %arg1[%c0, %c0_0] : memref<8x128xf32, #tpu.memory_space<vmem>>, vector<8x128xf32>
    %c0_1 = arith.constant 0 : index
    %c0_2 = arith.constant 0 : index
    %1 = vector.load %arg2[%c0_1, %c0_2] : memref<8x128xf32, #tpu.memory_space<vmem>>, vector<8x128xf32>
    %2 = arith.mulf %0, %0 : vector<8x128xf32>
    %cst = arith.constant dense<0.000000e+00> : vector<8xf32>
    %3 = vector.multi_reduction <add>, %2, %cst [1] : vector<8x128xf32> to vector<8xf32>
    %4 = vector.shape_cast %3 : vector<8xf32> to vector<8x1xf32>
    %cst_3 = arith.constant 1.000000e-24 : f32
    %5 = vector.broadcast %cst_3 : f32 to vector<8x1xf32>
    %6 = arith.maximumf %4, %5 : vector<8x1xf32>
    %7 = math.rsqrt %6 : vector<8x1xf32>
    %8 = arith.mulf %1, %1 : vector<8x128xf32>
    %cst_4 = arith.constant dense<0.000000e+00> : vector<8xf32>
    %9 = vector.multi_reduction <add>, %8, %cst_4 [1] : vector<8x128xf32> to vector<8xf32>
    %10 = vector.shape_cast %9 : vector<8xf32> to vector<8x1xf32>
    %cst_5 = arith.constant 1.000000e-24 : f32
    %11 = vector.broadcast %cst_5 : f32 to vector<8x1xf32>
    %12 = arith.maximumf %10, %11 : vector<8x1xf32>
    %13 = math.rsqrt %12 : vector<8x1xf32>
    %cst_6 = arith.constant 2.000000e+01 : f32
    %14 = vector.broadcast %cst_6 : f32 to vector<8x1xf32>
    %15 = arith.mulf %7, %14 : vector<8x1xf32>
    %16 = vector.broadcast %15 : vector<8x1xf32> to vector<8x128xf32>
    %17 = arith.mulf %0, %16 : vector<8x128xf32>
    %18 = arith.truncf %17 : vector<8x128xf32> to vector<8x128xbf16>
    %19 = vector.broadcast %13 : vector<8x1xf32> to vector<8x128xf32>
    %20 = arith.mulf %1, %19 : vector<8x128xf32>
    %21 = arith.truncf %20 : vector<8x128xf32> to vector<8x128xbf16>
    %cst_7 = arith.constant dense<0.000000e+00> : vector<8x8xf32>
    %22 = tpu.matmul %18, %21, %cst_7 {dimension_numbers = #tpu.dot_dimension_numbers<[1], [1], [0], [0], [0, 0, 1, 0], [], []>} : vector<8x128xbf16>, vector<8x128xbf16>, vector<8x8xf32> -> vector<8x8xf32>
    %c0_8 = arith.constant 0 : index
    %c0_9 = arith.constant 0 : index
    %23 = vector.load %arg3[%c0_8, %c0_9] : memref<8x1xi32, #tpu.memory_space<vmem>>, vector<8x1xi32>
    %c0_10 = arith.constant 0 : index
    %c0_11 = arith.constant 0 : index
    %24 = vector.load %arg4[%c0_10, %c0_11] : memref<1x8xi32, #tpu.memory_space<vmem>>, vector<1x8xi32>
    %25 = vector.broadcast %23 : vector<8x1xi32> to vector<8x8xi32>
    %26 = vector.broadcast %24 : vector<1x8xi32> to vector<8x8xi32>
    %27 = arith.cmpi eq, %25, %26 : vector<8x8xi32>
    %cst_12 = arith.constant 0.000000e+00 : f32
    %28 = vector.broadcast %cst_12 : f32 to vector<8x8xf32>
    %29 = arith.select %27, %22, %28 : vector<8x8xi1>, vector<8x8xf32>
    %cst_13 = arith.constant dense<0.000000e+00> : vector<8xf32>
    %30 = vector.multi_reduction <add>, %29, %cst_13 [1] : vector<8x8xf32> to vector<8xf32>
    %31 = vector.shape_cast %30 : vector<8xf32> to vector<8x1xf32>
    %32 = arith.extui %27 : vector<8x8xi1> to vector<8x8xi32>
    %33 = arith.sitofp %32 : vector<8x8xi32> to vector<8x8xf32>
    %cst_14 = arith.constant dense<0.000000e+00> : vector<8xf32>
    %34 = vector.multi_reduction <add>, %33, %cst_14 [1] : vector<8x8xf32> to vector<8xf32>
    %35 = vector.shape_cast %34 : vector<8xf32> to vector<8x1xf32>
    %cst_15 = arith.constant 9.99999997E-7 : f32
    %36 = vector.broadcast %cst_15 : f32 to vector<8x1xf32>
    %37 = arith.maximumf %35, %36 : vector<8x1xf32>
    %38 = tpu.reciprocal %37 {approx = true} : vector<8x1xf32> -> vector<8x1xf32>
    %39 = arith.mulf %31, %38 : vector<8x1xf32>
    %cst_16 = arith.constant 0.000000e+00 : f32
    %40 = vector.broadcast %cst_16 : f32 to vector<8x8xf32>
    %41 = arith.select %27, %40, %22 : vector<8x8xi1>, vector<8x8xf32>
    %cst_17 = arith.constant dense<0xFF800000> : vector<8xf32>
    %42 = vector.multi_reduction <maximumf>, %41, %cst_17 [1] : vector<8x8xf32> to vector<8xf32>
    %43 = vector.shape_cast %42 : vector<8xf32> to vector<8x1xf32>
    %44 = arith.maximumf %39, %43 : vector<8x1xf32>
    %45 = arith.subf %39, %44 : vector<8x1xf32>
    %46 = math.exp %45 : vector<8x1xf32>
    %47 = vector.broadcast %44 : vector<8x1xf32> to vector<8x8xf32>
    %48 = arith.subf %41, %47 : vector<8x8xf32>
    %49 = math.exp %48 : vector<8x8xf32>
    %cst_18 = arith.constant dense<0.000000e+00> : vector<8xf32>
    %50 = vector.multi_reduction <add>, %49, %cst_18 [1] : vector<8x8xf32> to vector<8xf32>
    %51 = vector.shape_cast %50 : vector<8xf32> to vector<8x1xf32>
    %52 = arith.addf %46, %51 : vector<8x1xf32>
    %53 = math.log %52 : vector<8x1xf32>
    %54 = arith.addf %44, %53 : vector<8x1xf32>
    %55 = arith.subf %54, %39 : vector<8x1xf32>
    %c0_19 = arith.constant 0 : index
    %c0_20 = arith.constant 0 : index
    %56 = vector.load %arg12[%c0_19, %c0_20] : memref<8x1xf32, #tpu.memory_space<vmem>>, vector<8x1xf32>
    tpu.vector_store %arg12[%c0_19, %c0_20], %55 {strides = array<i32>} : memref<8x1xf32, #tpu.memory_space<vmem>>, vector<8x1xf32>,
    %57 = arith.truncf %0 : vector<8x128xf32> to vector<8x128xbf16>
    %c0_21 = arith.constant 0 : index
    %c0_22 = arith.constant 0 : index
    %58 = vector.load %arg6[%c0_21, %c0_22] : memref<128x128xbf16, #tpu.memory_space<vmem>>, vector<128x128xbf16>
    %cst_23 = arith.constant dense<0.000000e+00> : vector<8x128xf32>
    %59 = tpu.matmul %57, %58, %cst_23 {dimension_numbers = #tpu.dot_dimension_numbers<[1], [0], [0], [1], [0, 0, 1, 1], [], []>} : vector<8x128xbf16>, vector<128x128xbf16>, vector<8x128xf32> -> vector<8x128xf32>
    %c0_24 = arith.constant 0 : index
    %c0_25 = arith.constant 0 : index
    %60 = vector.load %arg7[%c0_24, %c0_25] : memref<1x128xf32, #tpu.memory_space<vmem>>, vector<1x128xf32>
    %61 = vector.broadcast %60 : vector<1x128xf32> to vector<8x128xf32>
    %62 = arith.addf %59, %61 : vector<8x128xf32>
    %63 = math.tanh %62 : vector<8x128xf32>
    %64 = arith.truncf %63 : vector<8x128xf32> to vector<8x128xbf16>
    %c0_26 = arith.constant 0 : index
    %c0_27 = arith.constant 0 : index
    %65 = vector.load %arg8[%c0_26, %c0_27] : memref<128x128xbf16, #tpu.memory_space<vmem>>, vector<128x128xbf16>
    %cst_28 = arith.constant dense<0.000000e+00> : vector<8x128xf32>
    %66 = tpu.matmul %64, %65, %cst_28 {dimension_numbers = #tpu.dot_dimension_numbers<[1], [0], [0], [1], [0, 0, 1, 1], [], []>} : vector<8x128xbf16>, vector<128x128xbf16>, vector<8x128xf32> -> vector<8x128xf32>
    %c0_29 = arith.constant 0 : index
    %c0_30 = arith.constant 0 : index
    %67 = vector.load %arg9[%c0_29, %c0_30] : memref<1x128xf32, #tpu.memory_space<vmem>>, vector<1x128xf32>
    %68 = vector.broadcast %67 : vector<1x128xf32> to vector<8x128xf32>
    %69 = arith.addf %66, %68 : vector<8x128xf32>
    %70 = math.tanh %69 : vector<8x128xf32>
    %71 = arith.truncf %70 : vector<8x128xf32> to vector<8x128xbf16>
    %c0_31 = arith.constant 0 : index
    %c0_32 = arith.constant 0 : index
    %72 = vector.load %arg10[%c0_31, %c0_32] : memref<128x128xbf16, #tpu.memory_space<vmem>>, vector<128x128xbf16>
    %cst_33 = arith.constant dense<0.000000e+00> : vector<8x128xf32>
    %73 = tpu.matmul %71, %72, %cst_33 {dimension_numbers = #tpu.dot_dimension_numbers<[1], [0], [0], [1], [0, 0, 1, 1], [], []>} : vector<8x128xbf16>, vector<128x128xbf16>, vector<8x128xf32> -> vector<8x128xf32>
    %c0_34 = arith.constant 0 : index
    %c0_35 = arith.constant 0 : index
    %74 = vector.load %arg11[%c0_34, %c0_35] : memref<1x128xf32, #tpu.memory_space<vmem>>, vector<1x128xf32>
    %75 = vector.broadcast %74 : vector<1x128xf32> to vector<8x128xf32>
    %76 = arith.addf %73, %75 : vector<8x128xf32>
    %77 = tpu.iota {dimensions = array<i32: 1>} : vector<8x128xi32>
    %c8_i32 = arith.constant 8 : i32
    %78 = vector.broadcast %c8_i32 : i32 to vector<8x128xi32>
    %79 = arith.cmpi slt, %77, %78 : vector<8x128xi32>
    %cst_36 = arith.constant -1.000000e+30 : f32
    %80 = vector.broadcast %cst_36 : f32 to vector<8x128xf32>
    %81 = arith.select %79, %76, %80 : vector<8x128xi1>, vector<8x128xf32>
    %cst_37 = arith.constant dense<0xFF800000> : vector<8xf32>
    %82 = vector.multi_reduction <maximumf>, %81, %cst_37 [1] : vector<8x128xf32> to vector<8xf32>
    %83 = vector.shape_cast %82 : vector<8xf32> to vector<8x1xf32>
    %84 = vector.broadcast %83 : vector<8x1xf32> to vector<8x128xf32>
    %85 = arith.subf %81, %84 : vector<8x128xf32>
    %86 = math.exp %85 : vector<8x128xf32>
    %cst_38 = arith.constant dense<0.000000e+00> : vector<8xf32>
    %87 = vector.multi_reduction <add>, %86, %cst_38 [1] : vector<8x128xf32> to vector<8xf32>
    %88 = vector.shape_cast %87 : vector<8xf32> to vector<8x1xf32>
    %89 = math.log %88 : vector<8x1xf32>
    %90 = arith.addf %83, %89 : vector<8x1xf32>
    %c0_39 = arith.constant 0 : index
    %c0_40 = arith.constant 0 : index
    %91 = vector.load %arg5[%c0_39, %c0_40] : memref<8x1xi32, #tpu.memory_space<vmem>>, vector<8x1xi32>
    %92 = vector.broadcast %91 : vector<8x1xi32> to vector<8x128xi32>
    %93 = arith.cmpi eq, %77, %92 : vector<8x128xi32>
    %cst_41 = arith.constant 0.000000e+00 : f32
    %94 = vector.broadcast %cst_41 : f32 to vector<8x128xf32>
    %95 = arith.select %93, %81, %94 : vector<8x128xi1>, vector<8x128xf32>
    %cst_42 = arith.constant dense<0.000000e+00> : vector<8xf32>
    %96 = vector.multi_reduction <add>, %95, %cst_42 [1] : vector<8x128xf32> to vector<8xf32>
    %97 = vector.shape_cast %96 : vector<8xf32> to vector<8x1xf32>
    %98 = arith.subf %90, %97 : vector<8x1xf32>
    %c0_43 = arith.constant 0 : index
    %c0_44 = arith.constant 0 : index
    %99 = vector.load %arg13[%c0_43, %c0_44] : memref<8x1xf32, #tpu.memory_space<vmem>>, vector<8x1xf32>
    tpu.vector_store %arg13[%c0_43, %c0_44], %98 {strides = array<i32>} : memref<8x1xf32, #tpu.memory_space<vmem>>, vector<8x1xf32>,
    return
  }
  func.func @transform_0(%arg0: i32) -> (i32, i32) {
    %c0_i32 = arith.constant 0 : i32
    %c0_i32_0 = arith.constant 0 : i32
    return %arg0, %c0_i32 : i32, i32
  }
  func.func @transform_1(%arg0: i32) -> (i32, i32) {
    %c0_i32 = arith.constant 0 : i32
    %c0_i32_0 = arith.constant 0 : i32
    %c0_i32_1 = arith.constant 0 : i32
    return %c0_i32, %c0_i32_0 : i32, i32
  }
  func.func @transform_2(%arg0: i32) -> (i32, i32) {
    %c0_i32 = arith.constant 0 : i32
    %c0_i32_0 = arith.constant 0 : i32
    return %arg0, %c0_i32 : i32, i32
  }
  func.func @transform_3(%arg0: i32) -> (i32, i32) {
    %c0_i32 = arith.constant 0 : i32
    %c0_i32_0 = arith.constant 0 : i32
    %c0_i32_1 = arith.constant 0 : i32
    return %c0_i32, %c0_i32_0 : i32, i32
  }
  func.func @transform_4(%arg0: i32) -> (i32, i32) {
    %c0_i32 = arith.constant 0 : i32
    %c0_i32_0 = arith.constant 0 : i32
    return %arg0, %c0_i32 : i32, i32
  }
  func.func @transform_5(%arg0: i32) -> (i32, i32) {
    %c0_i32 = arith.constant 0 : i32
    %c0_i32_0 = arith.constant 0 : i32
    %c0_i32_1 = arith.constant 0 : i32
    return %c0_i32, %c0_i32_0 : i32, i32
  }
  func.func @transform_6(%arg0: i32) -> (i32, i32) {
    %c0_i32 = arith.constant 0 : i32
    %c0_i32_0 = arith.constant 0 : i32
    %c0_i32_1 = arith.constant 0 : i32
    return %c0_i32, %c0_i32_0 : i32, i32
  }
  func.func @transform_7(%arg0: i32) -> (i32, i32) {
    %c0_i32 = arith.constant 0 : i32
    %c0_i32_0 = arith.constant 0 : i32
    %c0_i32_1 = arith.constant 0 : i32
    return %c0_i32, %c0_i32_0 : i32, i32
  }
  func.func @transform_8(%arg0: i32) -> (i32, i32) {
    %c0_i32 = arith.constant 0 : i32
    %c0_i32_0 = arith.constant 0 : i32
    %c0_i32_1 = arith.constant 0 : i32
    return %c0_i32, %c0_i32_0 : i32, i32
  }
  func.func @transform_9(%arg0: i32) -> (i32, i32) {
    %c0_i32 = arith.constant 0 : i32
    %c0_i32_0 = arith.constant 0 : i32
    %c0_i32_1 = arith.constant 0 : i32
    return %c0_i32, %c0_i32_0 : i32, i32
  }
  func.func @transform_10(%arg0: i32) -> (i32, i32) {
    %c0_i32 = arith.constant 0 : i32
    %c0_i32_0 = arith.constant 0 : i32
    %c0_i32_1 = arith.constant 0 : i32
    return %c0_i32, %c0_i32_0 : i32, i32
  }
  func.func @transform_11(%arg0: i32) -> (i32, i32) {
    %c0_i32 = arith.constant 0 : i32
    %c0_i32_0 = arith.constant 0 : i32
    return %arg0, %c0_i32 : i32, i32
  }
  func.func @transform_12(%arg0: i32) -> (i32, i32) {
    %c0_i32 = arith.constant 0 : i32
    %c0_i32_0 = arith.constant 0 : i32
    return %arg0, %c0_i32 : i32, i32
  }
}

</mosaic_0001>

<bundles_post_ra>
// kernel: tpu_custom_call.1
= control target key start
LH: loop header
LB: loop body
LE: loop exit
PB: predicated region body
PF: predicated region fallthrough
CT: control target
= control target key end

     0   :  { %18 = vsyncpa [#allocation3], 0  ;;  %s1454_s0 = inlined_call_operand.hbm [shape: f32[8,128], index: 0, kind: input, shape index: {}]   ;;  %s1455_s1 = inlined_call_operand.hbm [shape: f32[8,128], index: 1, kind: input, shape index: {}]   ;;  %s1456_s2 = inlined_call_operand.hbm [shape: s32[8,1], index: 2, kind: input, shape index: {}]   ;;  %s1457_s3 = inlined_call_operand.hbm [shape: s32[1,8], index: 3, kind: input, shape index: {}]   ;;  %s1458_s4 = inlined_call_operand.hbm [shape: s32[8,1], index: 4, kind: input, shape index: {}]   ;;  %s1459_s5 = inlined_call_operand.hbm [shape: bf16[128,128], index: 5, kind: input, shape index: {}]   ;;  %s1460_s6 = inlined_call_operand.hbm [shape: f32[1,128], index: 6, kind: input, shape index: {}]   ;;  %s1461_s7 = inlined_call_operand.hbm [shape: bf16[128,128], index: 7, kind: input, shape index: {}]   ;;  %s1462_s8 = inlined_call_operand.hbm [shape: f32[1,128], index: 8, kind: input, shape index: {}]   ;;  %s1463_s9 = inlined_call_operand.hbm [shape: bf16[128,128], index: 9, kind: input, shape index: {}]   ;;  %s1464_s10 = inlined_call_operand.hbm [shape: f32[1,128], index: 10, kind: input, shape index: {}]   ;;  %s1465_s11 = inlined_call_operand.hbm [shape: f32[8,1], index: 11, kind: output, shape index: {0}]   ;;  %s1466_s12 = inlined_call_operand.hbm [shape: f32[8,1], index: 12, kind: output, shape index: {1}]  }
   0x1   :  { %19 = vsyncpa [#allocation6], 0 }
   0x2   :  { %20 = vsyncpa [#allocation9], 0 }
   0x3   :  { %21 = vsyncpa [#allocation12], 0 }
   0x4   :  { %22 = vsyncpa [#allocation15], 0 }
   0x5   :  { %23 = vsyncpa [#allocation18], 0 }
   0x6   :  { %24 = vsyncpa [#allocation4], 0 }
   0x7   :  { %25 = vsyncpa [#allocation22], 0  ;;  %s1163_s21 = smov [#allocation5]   ;;  %s1164_s23 = smov [#allocation8]  }
   0x8   :  { %s42_s22 = sshll.u32 %s1163_s21, 4  ;;  %s62_s24 = sshll.u32 %s1164_s23, 4  ;;  %s43_s22 = int_to_ptr.vmem [resolvable:$true] %s42_s22  ;;  %s63_s24 = int_to_ptr.vmem [resolvable:$true] %s62_s24 }
   0x9   :  { %s861_s27 = scalar_lea.hbm %s1455_s1, 128 }
   0xa   :  { %p862_p0 = scmp.ne.s32.totalorder %s1455_s1, %s861_s27  ;;  %p865_p1 = scmp.lt.u32.totalorder %s861_s27, %s1455_s1 }
   0xc   :  { %p867_p2 = pnand %p865_p1, %p862_p0 }
   0xe   :  { %870 = shalt.err (!%p867_p2)
}
   0xf   :  { %s871_s14 = scalar_lea.vmem %s43_s22, 128  ;;  %p876_p4 = scmp.lt.s32.totalorder %s43_s22, %s43_s22 }
  0x10   :  { %p872_p3 = scmp.ne.s32.totalorder %s43_s22, %s871_s14  ;;  %p877_p5 = scmp.lt.s32.totalorder %s871_s14, %s871_s14 }
  0x12   :  { %p878_p6 = por %p877_p5, %p876_p4 }
  0x14   :  { %p879_p7 = pnand %p878_p6, %p872_p3 }
  0x16   :  { %882 = shalt.err (!%p879_p7)
}
  0x17   :  { %45 = dma.hbm_to_vmem [thread:$0]  %s1455_s1, 128, %s43_s22, [#allocation6]  }
  0x18   :  { %s883_s19 = scalar_lea.hbm %s1457_s3, 16 }
  0x19   :  { %p884_p8 = scmp.ne.s32.totalorder %s1457_s3, %s883_s19  ;;  %p887_p9 = scmp.lt.u32.totalorder %s883_s19, %s1457_s3 }
  0x1b   :  { %p889_p10 = pnand %p887_p9, %p884_p8 }
  0x1d   :  { %892 = shalt.err (!%p889_p10)
}
  0x1e   :  { %s893_s26 = scalar_lea.vmem %s63_s24, 16  ;;  %s897_s27 = scalar_lea.vmem %s63_s24, 32 }
  0x1f   :  { %p894_p11 = scmp.ne.s32.totalorder %s63_s24, %s893_s26  ;;  %p898_p12 = scmp.lt.s32.totalorder %s63_s24, %s63_s24 }
  0x20   :  { %p899_p13 = scmp.lt.s32.totalorder %s897_s27, %s893_s26 }
  0x22   :  { %p900_p0 = por %p899_p13, %p898_p12 }
  0x24   :  { %p901_p1 = pnand %p900_p0, %p894_p11 }
  0x26   :  { %904 = shalt.err (!%p901_p1)
}
  0x27   :  { %65 = dma.hbm_to_vmem [thread:$0]  %s1457_s3, 16, %s63_s24, [#allocation9]  }
  0x28   :  { %s1165_s28 = smov [#allocation11]   ;;  %s905_s14 = scalar_lea.hbm %s1459_s5, 1024 }
  0x29   :  { %s81_s29 = sshll.u32 %s1165_s28, 4  ;;  %p906_p2 = scmp.ne.s32.totalorder %s1459_s5, %s905_s14  ;;  %s82_s29 = int_to_ptr.vmem [resolvable:$true] %s81_s29 }
  0x2a   :  { %p909_p3 = scmp.lt.u32.totalorder %s905_s14, %s1459_s5 }
  0x2c   :  { %p911_p4 = pnand %p909_p3, %p906_p2 }
  0x2e   :  { %914 = shalt.err (!%p911_p4)
}
  0x2f   :  { %s915_s19 = scalar_lea.vmem %s82_s29, 1024  ;;  %p920_p6 = scmp.lt.s32.totalorder %s82_s29, %s82_s29 }
  0x30   :  { %p916_p5 = scmp.ne.s32.totalorder %s82_s29, %s915_s19  ;;  %p921_p7 = scmp.lt.s32.totalorder %s915_s19, %s915_s19 }
  0x32   :  { %p922_p8 = por %p921_p7, %p920_p6 }
  0x34   :  { %p923_p9 = pnand %p922_p8, %p916_p5 }
  0x36   :  { %926 = shalt.err (!%p923_p9)
}
  0x37   :  { %s1166_s3 = smov 64   ;;  %s1167_s24 = smov 4  }
  0x38   :  { %87 = dma.hbm_to_vmem [thread:$0]  %s1459_s5, 1024, %s82_s29, [#allocation12], %s1166_s3, %s1166_s3, %s1167_s24  }
  0x39   :  { %s1168_s23 = smov [#allocation14]   ;;  %s1169_s26 = smov [#allocation17]  }
  0x3a   :  { %s103_s25 = sshll.u32 %s1168_s23, 4  ;;  %s125_s27 = sshll.u32 %s1169_s26, 4  ;;  %s104_s25 = int_to_ptr.vmem [resolvable:$true] %s103_s25  ;;  %s126_s27 = int_to_ptr.vmem [resolvable:$true] %s125_s27 }
  0x3b   :  { %s927_s28 = scalar_lea.hbm %s1461_s7, 1024 }
  0x3c   :  { %p928_p10 = scmp.ne.s32.totalorder %s1461_s7, %s927_s28  ;;  %p931_p11 = scmp.lt.u32.totalorder %s927_s28, %s1461_s7 }
  0x3e   :  { %p933_p12 = pnand %p931_p11, %p928_p10 }
  0x40   :  { %936 = shalt.err (!%p933_p12)
}
  0x41   :  { %s937_s5 = scalar_lea.vmem %s104_s25, 1024  ;;  %p942_p0 = scmp.lt.s32.totalorder %s104_s25, %s104_s25 }
  0x42   :  { %p938_p13 = scmp.ne.s32.totalorder %s104_s25, %s937_s5  ;;  %p943_p1 = scmp.lt.s32.totalorder %s937_s5, %s937_s5 }
  0x44   :  { %p944_p2 = por %p943_p1, %p942_p0 }
  0x46   :  { %p945_p3 = pnand %p944_p2, %p938_p13 }
  0x48   :  { %948 = shalt.err (!%p945_p3)
}
  0x49   :  { %109 = dma.hbm_to_vmem [thread:$0]  %s1461_s7, 1024, %s104_s25, [#allocation15], %s1166_s3, %s1166_s3, %s1167_s24  }
  0x4a   :  { %s949_s19 = scalar_lea.hbm %s1463_s9, 1024 }
  0x4b   :  { %p950_p4 = scmp.ne.s32.totalorder %s1463_s9, %s949_s19  ;;  %p953_p5 = scmp.lt.u32.totalorder %s949_s19, %s1463_s9 }
  0x4d   :  { %p955_p6 = pnand %p953_p5, %p950_p4 }
  0x4f   :  { %958 = shalt.err (!%p955_p6)
}
  0x50   :  { %s959_s1 = scalar_lea.vmem %s126_s27, 1024  ;;  %p964_p8 = scmp.lt.s32.totalorder %s126_s27, %s126_s27 }
  0x51   :  { %p960_p7 = scmp.ne.s32.totalorder %s126_s27, %s959_s1  ;;  %p965_p9 = scmp.lt.s32.totalorder %s959_s1, %s959_s1 }
  0x53   :  { %p966_p10 = por %p965_p9, %p964_p8 }
  0x55   :  { %p967_p11 = pnand %p966_p10, %p960_p7 }
  0x57   :  { %970 = shalt.err (!%p967_p11)
}
  0x58   :  { %131 = dma.hbm_to_vmem [thread:$0]  %s1463_s9, 1024, %s126_s27, [#allocation18], %s1166_s3, %s1166_s3, %s1167_s24  }
  0x59   :  { %s1170_s22 = smov [#allocation2]   ;;  %s1171_s30 = smov [#allocation7]  }
  0x5a   :  { %s32_s28 = sshll.u32 %s1170_s22, 4  ;;  %s52_s13 = sshll.u32 %s1171_s30, 4  ;;  %s33_s28 = int_to_ptr.vmem [resolvable:$true] %s32_s28  ;;  %s53_s13 = int_to_ptr.vmem [resolvable:$true] %s52_s13 }
  0x5b   :  { %s971_s5 = scalar_lea.hbm %s1454_s0, 128 }
  0x5c   :  { %p972_p12 = scmp.ne.s32.totalorder %s1454_s0, %s971_s5  ;;  %p975_p13 = scmp.lt.u32.totalorder %s971_s5, %s1454_s0 }
  0x5e   :  { %p977_p0 = pnand %p975_p13, %p972_p12 }
  0x60   :  { %980 = shalt.err (!%p977_p0)
}
  0x61   :  { %s981_s9 = scalar_lea.vmem %s33_s28, 128  ;;  %p986_p2 = scmp.lt.s32.totalorder %s33_s28, %s33_s28 }
  0x62   :  { %p982_p1 = scmp.ne.s32.totalorder %s33_s28, %s981_s9  ;;  %p987_p3 = scmp.lt.s32.totalorder %s981_s9, %s981_s9 }
  0x64   :  { %p988_p4 = por %p987_p3, %p986_p2 }
  0x66   :  { %p989_p5 = pnand %p988_p4, %p982_p1 }
  0x68   :  { %992 = shalt.err (!%p989_p5)
}
  0x69   :  { %35 = dma.hbm_to_vmem [thread:$0]  %s1454_s0, 128, %s33_s28, [#allocation3]  }
  0x6a   :  { %s993_s20 = scalar_lea.hbm %s1456_s2, 128 }
  0x6b   :  { %p994_p6 = scmp.ne.s32.totalorder %s1456_s2, %s993_s20  ;;  %p997_p7 = scmp.lt.u32.totalorder %s993_s20, %s1456_s2 }
  0x6d   :  { %p999_p8 = pnand %p997_p7, %p994_p6 }
  0x6f   :  { %1002 = shalt.err (!%p999_p8)
}
  0x70   :  { %s1003_s7 = scalar_lea.vmem %s53_s13, 128  ;;  %p1008_p10 = scmp.lt.s32.totalorder %s53_s13, %s53_s13 }
  0x71   :  { %p1004_p9 = scmp.ne.s32.totalorder %s53_s13, %s1003_s7  ;;  %p1009_p11 = scmp.lt.s32.totalorder %s1003_s7, %s1003_s7 }
  0x73   :  { %p1010_p12 = por %p1009_p11, %p1008_p10 }
  0x75   :  { %p1011_p13 = pnand %p1010_p12, %p1004_p9 }
  0x77   :  { %1014 = shalt.err (!%p1011_p13)
}
  0x78   :  { %55 = dma.hbm_to_vmem [thread:$0]  %s1456_s2, 128, %s53_s13, [#allocation6]  }
  0x79   :  { %s1172_s22 = smov [#allocation10]   ;;  %s1173_s30 = smov [#allocation13]  }
  0x7a   :  { %s72_s28 = sshll.u32 %s1172_s22, 4  ;;  %s94_s14 = sshll.u32 %s1173_s30, 4  ;;  %s73_s28 = int_to_ptr.vmem [resolvable:$true] %s72_s28  ;;  %s95_s14 = int_to_ptr.vmem [resolvable:$true] %s94_s14 }
  0x7b   :  { %s1015_s29 = scalar_lea.hbm %s1458_s4, 128 }
  0x7c   :  { %p1016_p0 = scmp.ne.s32.totalorder %s1458_s4, %s1015_s29  ;;  %p1019_p1 = scmp.lt.u32.totalorder %s1015_s29, %s1458_s4 }
  0x7e   :  { %p1021_p2 = pnand %p1019_p1, %p1016_p0 }
  0x80   :  { %1024 = shalt.err (!%p1021_p2)
}
  0x81   :  { %s1025_s2 = scalar_lea.vmem %s73_s28, 128  ;;  %p1030_p4 = scmp.lt.s32.totalorder %s73_s28, %s73_s28 }
  0x82   :  { %p1026_p3 = scmp.ne.s32.totalorder %s73_s28, %s1025_s2  ;;  %p1031_p5 = scmp.lt.s32.totalorder %s1025_s2, %s1025_s2 }
  0x84   :  { %p1032_p6 = por %p1031_p5, %p1030_p4 }
  0x86   :  { %p1033_p7 = pnand %p1032_p6, %p1026_p3 }
  0x88   :  { %1036 = shalt.err (!%p1033_p7)
}
  0x89   :  { %75 = dma.hbm_to_vmem [thread:$0]  %s1458_s4, 128, %s73_s28, [#allocation9]  }
  0x8a   :  { %s1037_s19 = scalar_lea.hbm %s1460_s6, 16 }
  0x8b   :  { %p1038_p8 = scmp.ne.s32.totalorder %s1460_s6, %s1037_s19  ;;  %p1041_p9 = scmp.lt.u32.totalorder %s1037_s19, %s1460_s6 }
  0x8d   :  { %p1043_p10 = pnand %p1041_p9, %p1038_p8 }
  0x8f   :  { %1046 = shalt.err (!%p1043_p10)
}
  0x90   :  { %s1047_s1 = scalar_lea.vmem %s95_s14, 16  ;;  %s1051_s7 = scalar_lea.vmem %s95_s14, 32 }
  0x91   :  { %p1048_p11 = scmp.ne.s32.totalorder %s95_s14, %s1047_s1  ;;  %p1052_p12 = scmp.lt.s32.totalorder %s95_s14, %s95_s14 }
  0x92   :  { %p1053_p13 = scmp.lt.s32.totalorder %s1051_s7, %s1047_s1 }
  0x94   :  { %p1054_p0 = por %p1053_p13, %p1052_p12 }
  0x96   :  { %p1055_p1 = pnand %p1054_p0, %p1048_p11 }
  0x98   :  { %1058 = shalt.err (!%p1055_p1)
}
  0x99   :  { %97 = dma.hbm_to_vmem [thread:$0]  %s1460_s6, 16, %s95_s14, [#allocation12]  }
  0x9a   :  { %s1174_s25 = smov [#allocation16]   ;;  %s1175_s28 = smov [#allocation19]  }
  0x9b   :  { %s116_s22 = sshll.u32 %s1174_s25, 4  ;;  %s138_s30 = sshll.u32 %s1175_s28, 4  ;;  %s117_s22 = int_to_ptr.vmem [resolvable:$true] %s116_s22  ;;  %s139_s30 = int_to_ptr.vmem [resolvable:$true] %s138_s30 }
  0x9c   :  { %s1059_s29 = scalar_lea.hbm %s1462_s8, 16 }
  0x9d   :  { %p1060_p2 = scmp.ne.s32.totalorder %s1462_s8, %s1059_s29  ;;  %p1063_p3 = scmp.lt.u32.totalorder %s1059_s29, %s1462_s8 }
  0x9f   :  { %p1065_p4 = pnand %p1063_p3, %p1060_p2 }
  0xa1   :  { %1068 = shalt.err (!%p1065_p4)
}
  0xa2   :  { %s1069_s6 = scalar_lea.vmem %s117_s22, 16  ;;  %s1073_s14 = scalar_lea.vmem %s117_s22, 32 }
  0xa3   :  { %p1070_p5 = scmp.ne.s32.totalorder %s117_s22, %s1069_s6  ;;  %p1074_p6 = scmp.lt.s32.totalorder %s117_s22, %s117_s22 }
  0xa4   :  { %p1075_p7 = scmp.lt.s32.totalorder %s1073_s14, %s1069_s6 }
  0xa6   :  { %p1076_p8 = por %p1075_p7, %p1074_p6 }
  0xa8   :  { %p1077_p9 = pnand %p1076_p8, %p1070_p5 }
  0xaa   :  { %1080 = shalt.err (!%p1077_p9)
}
  0xab   :  { %119 = dma.hbm_to_vmem [thread:$0]  %s1462_s8, 16, %s117_s22, [#allocation15]  }
  0xac   :  { %s1081_s27 = scalar_lea.hbm %s1464_s10, 16 }
  0xad   :  { %p1082_p10 = scmp.ne.s32.totalorder %s1464_s10, %s1081_s27  ;;  %p1085_p11 = scmp.lt.u32.totalorder %s1081_s27, %s1464_s10 }
  0xaf   :  { %p1087_p12 = pnand %p1085_p11, %p1082_p10 }
  0xb1   :  { %1090 = shalt.err (!%p1087_p12)
}
  0xb2   :  { %s1091_s26 = scalar_lea.vmem %s139_s30, 16  ;;  %s1095_s1 = scalar_lea.vmem %s139_s30, 32 }
  0xb3   :  { %p1092_p13 = scmp.ne.s32.totalorder %s139_s30, %s1091_s26  ;;  %p1096_p0 = scmp.lt.s32.totalorder %s139_s30, %s139_s30 }
  0xb4   :  { %p1097_p1 = scmp.lt.s32.totalorder %s1095_s1, %s1091_s26 }
  0xb6   :  { %p1098_p2 = por %p1097_p1, %p1096_p0 }
  0xb8   :  { %p1099_p3 = pnand %p1098_p2, %p1092_p13 }
  0xba   :  { %1102 = shalt.err (!%p1099_p3)
}
  0xbb   :  { %141 = dma.hbm_to_vmem [thread:$0]  %s1464_s10, 16, %s139_s30, [#allocation18]  }
  0xbc   :  { %1147 = dma.done.wait [#allocation3], 128  }
  0xbd   :  { %1148 = vsyncadd [#allocation3], 4294967168 }
  0xbe   :  { %1149 = dma.done.wait [#allocation6], 256  }
  0xbf   :  { %1150 = vsyncadd [#allocation6], 4294967040 }
  0xc0   :  { %1151 = dma.done.wait [#allocation9], 144  }
  0xc1   :  { %1152 = vsyncadd [#allocation9], 4294967152 }
  0xc2   :  { %1153 = dma.done.wait [#allocation12], 1040  }
  0xc3   :  { %1154 = vsyncadd [#allocation12], 4294966256 }
  0xc4   :  { %1155 = dma.done.wait [#allocation15], 1040  }
  0xc5   :  { %1156 = vsyncadd [#allocation15], 4294966256 }
  0xc6   :  { %1157 = dma.done.wait [#allocation18], 1040  }
  0xc7   :  { %1158 = vsyncadd [#allocation18], 4294966256  ;;  %v1176_v0 = vmov 0.0   ;;  %vm1177_vm0 = vmmov 0   ;;  %v817_v1 = vld [vmem:[#allocation11] sm:$0xff]   ;;  %v818_v4 = vld [vmem:[#allocation11 + $0x8] sm:$0xff]  }
  0xc8   :  { %737 = vmatprep.subr.bf16.mxu1 %v1176_v0  ;;  %753 = vmatprep.mubr.msk.bf16.mxu1 %vm1177_vm0, %v1176_v0  ;;  %v177_v2 = vld [vmem:[#allocation5] sm:$0xff]  ;;  %v176_v5 = vld [vmem:[#allocation2] sm:$0xff]  ;;  %v819_v7 = vld [vmem:[#allocation11 + $0x10] sm:$0xff]   ;;  %v1178_v15 = vmov 0   ;;  %vm244_vm1 = vcmask 64512   ;;  %vm275_vm4 = vcmask 7168  }
  0xc9   :  { %731 = vmatprep.subr.bf16.mxu0 %v1176_v0  ;;  %733 = vmatprep.mubr.msk.bf16.mxu0 %vm1177_vm0, %v1176_v0  ;;  %v183_v3 = vmul.f32 %v177_v2, %v177_v2  ;;  %v178_v6 = vmul.f32 %v176_v5, %v176_v5  ;;  %v820_v8 = vld [vmem:[#allocation11 + $0x18] sm:$0xff]   ;;  %v821_v9 = vld [vmem:[#allocation11 + $0x20] sm:$0xff]   ;;  %v822_v10 = vld [vmem:[#allocation11 + $0x28] sm:$0xff]   ;;  %v277_v13 = vpack.c.bf16 %v176_v5, %v176_v5  ;;  %s1179_s10 = smov [#allocation20]  }
  0xca   :  { %738 = vmatpush3.bf16.msra.mxu1 %v817_v1  ;;  %v823_v11 = vld [vmem:[#allocation11 + $0x30] sm:$0xff]   ;;  %v824_v12 = vld [vmem:[#allocation11 + $0x38] sm:$0xff]   ;;  %815 = vset.pattern.permute.xlu1 %v1178_v15  ;;  %v825_v27 = vld [vmem:[#allocation14] sm:$0xff]   ;;  %s645_s4 = sshll.u32 %s1179_s10, 4  ;;  %s646_s4 = int_to_ptr.vmem [resolvable:$true] %s645_s4 }
  0xcb   :  { %739 = vmatprep.subr.bf16.mxu1 %v1176_v0  ;;  %184 = vadd.xlane.f32.xlu0 %v183_v3  ;;  %v233_v14 = vld [vmem:[#allocation7] sm:$0xff]  ;;  %v673_v30 = vld [vmem:[#allocation8] ss:$0 sm:$0xff]  ;;  %v828_v31 = vld [vmem:[#allocation14 + $0x18] sm:$0xff]   ;;  %s1103_s0 = scalar_lea.vmem %s646_s4, 128  ;;  %p1108_p5 = scmp.lt.s32.totalorder %s646_s4, %s646_s4 }
  0xcc   :  { %816 = vset.pattern.permute.xlu0 %v1178_v15  ;;  %236 = vperm.xlu1 %815, %v233_v14   ;;  %v826_v28 = vld [vmem:[#allocation14 + $0x8] sm:$0xff]   ;;  %v827_v29 = vld [vmem:[#allocation14 + $0x10] sm:$0xff]   ;;  %v829_v34 = vld [vmem:[#allocation14 + $0x20] sm:$0xff]   ;;  %p1104_p4 = scmp.ne.s32.totalorder %s646_s4, %s1103_s0  ;;  %p1109_p6 = scmp.lt.s32.totalorder %s1103_s0, %s1103_s0 }
  0xcd   :  { %v830_v36 = vld [vmem:[#allocation14 + $0x28] sm:$0xff]   ;;  %v831_v37 = vld [vmem:[#allocation14 + $0x30] sm:$0xff]   ;;  %v832_v38 = vld [vmem:[#allocation14 + $0x38] sm:$0xff]  }
  0xce   :  { %740 = vmatpush3.bf16.msra.mxu1 %v818_v4  ;;  %v675_v39 = vld [vmem:[#allocation13] ss:$0 sm:$0xff]  ;;  %v833_v47 = vld [vmem:[#allocation17] sm:$0xff]   ;;  %v834_v48 = vld [vmem:[#allocation17 + $0x8] sm:$0xff]   ;;  %p1110_p7 = por %p1109_p6, %p1108_p5 }
  0xcf   :  { %741 = vmatprep.subr.bf16.mxu1 %v1176_v0  ;;  %179 = vadd.xlane.f32.xlu0 %v178_v6  ;;  %v835_v49 = vld [vmem:[#allocation17 + $0x10] sm:$0xff]   ;;  %v836_v50 = vld [vmem:[#allocation17 + $0x18] sm:$0xff]   ;;  %v837_v51 = vld [vmem:[#allocation17 + $0x20] sm:$0xff]  }
  0xd0   :  { %v838_v52 = vld [vmem:[#allocation17 + $0x28] sm:$0xff]   ;;  %v839_v53 = vld [vmem:[#allocation17 + $0x30] sm:$0xff]   ;;  %v840_v54 = vld [vmem:[#allocation17 + $0x38] sm:$0xff]   ;;  %p1111_p8 = pnand %p1110_p7, %p1104_p4 }
  0xd1   :  { %v684_v63 = vld [vmem:[#allocation16] ss:$0 sm:$0xff] }
  0xd2   :  { %742 = vmatpush3.bf16.msra.mxu1 %v819_v7 }
  0xd3   :  { %743 = vmatprep.subr.bf16.mxu1 %v1176_v0 }
  0xd6   :  { %744 = vmatpush3.bf16.msra.mxu1 %v820_v8 }
  0xd7   :  { %745 = vmatprep.subr.bf16.mxu1 %v1176_v0 }
  0xda   :  { %746 = vmatpush3.bf16.msra.mxu1 %v821_v9 }
  0xdb   :  { %747 = vmatprep.subr.bf16.mxu1 %v1176_v0 }
  0xde   :  { %748 = vmatpush3.bf16.msra.mxu1 %v822_v10 }
  0xdf   :  { %749 = vmatprep.subr.bf16.mxu1 %v1176_v0 }
  0xe2   :  { %750 = vmatpush3.bf16.msra.mxu1 %v823_v11 }
  0xe3   :  { %751 = vmatprep.subr.bf16.mxu1 %v1176_v0 }
  0xe6   :  { %752 = vmatpush3.bf16.msra.mxu1 %v824_v12 }
  0xe7   :  { %777 = vmatprep.subr.bf16.mxu1 %v1176_v0 }
  0xe9   :  { %754 = vmatmul.mubr.bf16.vlgmr.msra.gmra.mrb[0].mxu1 %v277_v13 }
  0xea   :  { %793 = vmatprep.mubr.msk.bf16.mxu1 %vm1177_vm0, %v1176_v0  ;;  %778 = vmatpush3.bf16.msra.mxu1 %v833_v47 }
  0xeb   :  { %779 = vmatprep.subr.bf16.mxu1 %v1176_v0 }
  0xee   :  { %780 = vmatpush3.bf16.msra.mxu1 %v834_v48 }
  0xef   :  { %781 = vmatprep.subr.bf16.mxu1 %v1176_v0 }
  0xf2   :  { %782 = vmatpush3.bf16.msra.mxu1 %v835_v49 }
  0xf3   :  { %783 = vmatprep.subr.bf16.mxu1 %v1176_v0 }
  0xf6   :  { %784 = vmatpush3.bf16.msra.mxu1 %v836_v50 }
  0xf7   :  { %785 = vmatprep.subr.bf16.mxu1 %v1176_v0 }
  0xfa   :  { %786 = vmatpush3.bf16.msra.mxu1 %v837_v51 }
  0xfb   :  { %787 = vmatprep.subr.bf16.mxu1 %v1176_v0 }
  0xfe   :  { %788 = vmatpush3.bf16.msra.mxu1 %v838_v52 }
  0xff   :  { %789 = vmatprep.subr.bf16.mxu1 %v1176_v0 }
 0x102   :  { %790 = vmatpush3.bf16.msra.mxu1 %v839_v53 }
 0x103   :  { %791 = vmatprep.subr.bf16.mxu1 %v1176_v0 }
 0x106   :  { %792 = vmatpush3.bf16.msra.mxu1 %v840_v54 }
 0x14b   :  { %v237_v32 = vpop.permute.xlu1 %236 }
 0x14c   :  { %vm242_vm2 = vcmp.eq.s32.totalorder %v237_v32, %v673_v30 }
 0x14d   :  { %v674_v33 = vsel %vm242_vm2, 1.0, %v1176_v0 }
 0x14e   :  { %v250_v35 = vsel %vm244_vm1, %v674_v33, 0.0 }
 0x14f   :  { %251 = vadd.xlane.f32.xlu1 %v250_v35 }
 0x158   :  { %v185_v16 = vpop.xlane.xlu0 %184 }
 0x159   :  { %v186_v17 = vmax.f32 %v185_v16, 1e-24 }
 0x15b   :  { %841 = vrsqrt.f32 %v186_v17 }
 0x15c   :  { %v180_v18 = vpop.xlane.xlu0 %179 }
 0x15d   :  { %v181_v19 = vmax.f32 %v180_v18, 1e-24 }
 0x15f   :  { %843 = vrsqrt.f32 %v181_v19 }
 0x165   :  { %v842_v20 = vpop.eup %841 }
 0x166   :  { %v191_v21 = vmul.f32 %v842_v20, %v177_v2 }
 0x168   :  { %v192_v22 = vpack.c.bf16 %v191_v21, %v191_v21 }
 0x169   :  { %v844_v23 = vpop.eup %843 }
 0x16a   :  { %v188_v24 = vmul.f32 20.0, %v844_v23  ;;  %732 = vmatpush3.bf16.xpose.msra.mxu0 %v192_v22  ;;  %v615_v22 = vlaneseq }
 0x16b   :  { %757 = vmatprep.subr.bf16.mxu0 %v1176_v0 }
 0x16c   :  { %v189_v25 = vmul.f32 %v188_v24, %v176_v5  ;;  %v616_v24 = vand.u32 127, %v615_v22 }
 0x16e   :  { %v190_v26 = vpack.c.bf16 %v189_v25, %v189_v25  ;;  %v693_v25 = vld [vmem:[#allocation19] ss:$0 sm:$0xff]  ;;  %vm617_vm3 = vcmp.lt.s32.totalorder %v616_v24, 8 }
 0x171   :  { %734 = vmatmul.mubr.bf16.vlgmr.msra.gmra.mrb[0].mxu0 %v190_v26 }
 0x172   :  { %758 = vmatpush3.bf16.msra.mxu0 %v825_v27  ;;  %773 = vmatprep.mubr.msk.bf16.mxu0 %vm1177_vm0, %v1176_v0 }
 0x173   :  { %759 = vmatprep.subr.bf16.mxu0 %v1176_v0 }
 0x176   :  { %760 = vmatpush3.bf16.msra.mxu0 %v826_v28 }
 0x177   :  { %761 = vmatprep.subr.bf16.mxu0 %v1176_v0 }
 0x17a   :  { %762 = vmatpush3.bf16.msra.mxu0 %v827_v29 }
 0x17b   :  { %763 = vmatprep.subr.bf16.mxu0 %v1176_v0 }
 0x17e   :  { %764 = vmatpush3.bf16.msra.mxu0 %v828_v31 }
 0x17f   :  { %765 = vmatprep.subr.bf16.mxu0 %v1176_v0 }
 0x182   :  { %766 = vmatpush3.bf16.msra.mxu0 %v829_v34 }
 0x183   :  { %767 = vmatprep.subr.bf16.mxu0 %v1176_v0 }
 0x186   :  { %768 = vmatpush3.bf16.msra.mxu0 %v830_v36  ;;  %v629_v36 = vld [vmem:[#allocation10] sm:$0xff] }
 0x187   :  { %769 = vmatprep.subr.bf16.mxu0 %v1176_v0 }
 0x18a   :  { %770 = vmatpush3.bf16.msra.mxu0 %v831_v37 }
 0x18b   :  { %771 = vmatprep.subr.bf16.mxu0 %v1176_v0 }
 0x18e   :  { %772 = vmatpush3.bf16.msra.mxu0 %v832_v38 }
 0x1bc   :  { %v383_v40 = vpop.f32.mrb[0].mxu1 }
 0x1bd   :  { %v384_v41 = vadd.f32 %v675_v39, %v383_v40  ;;  %v755_v42 = vpop.f32.mrb[1].mxu1 }
 0x1be   :  { %v386_v43 = vpop.f32.mrb[2].mxu1 }
 0x1bf   :  { %845 = vtanh.f32 %v384_v41  ;;  %v756_v44 = vpop.f32.mrb[3].mxu1 }
 0x1c9   :  { %v846_v45 = vpop.eup %845 }
 0x1ca   :  { %v390_v46 = vpack.c.bf16 %v846_v45, %v846_v45 }
 0x1cc   :  { %774 = vmatmul.mubr.bf16.vlgmr.msra.gmra.mrb[4].mxu0 %v390_v46 }
 0x1dc   :  { %v252_v7 = vpop.xlane.xlu1 %251 }
 0x1dd   :  { %v253_v8 = vmax.f32 %v252_v7, 1e-06 }
 0x244   :  { %v227_v55 = vpop.f32.mrb[0].mxu0 }
 0x245   :  { %v243_v56 = vsel %vm242_vm2, %v227_v55, 0.0  ;;  %v256_v57 = vsel %vm242_vm2, 0.0, %v227_v55  ;;  %v735_v58 = vpop.f32.mrb[1].mxu0 }
 0x246   :  { %v245_v59 = vsel %vm244_vm1, %v243_v56, 0.0  ;;  %v230_v60 = vpop.f32.mrb[2].mxu0  ;;  %v257_v62 = vsel %vm244_vm1, %v256_v57, -inf }
 0x247   :  { %246 = vadd.xlane.f32.xlu0 %v245_v59  ;;  %v736_v61 = vpop.f32.mrb[3].mxu0 }
 0x24b   :  { %258 = vmax.xlane.f32.xlu0 %v257_v62 }
 0x29f   :  { %v496_v1 = vpop.f32.mrb[4].mxu0 }
 0x2a0   :  { %v497_v2 = vadd.f32 %v684_v63, %v496_v1  ;;  %v775_v0 = vpop.f32.mrb[5].mxu0 }
 0x2a1   :  { %v499_v3 = vpop.f32.mrb[6].mxu0 }
 0x2a2   :  { %847 = vtanh.f32 %v497_v2  ;;  %v776_v4 = vpop.f32.mrb[7].mxu0 }
 0x2a3   :  { %849 = vrcp.f32 %v253_v8 }
 0x2ac   :  { %v848_v5 = vpop.eup %847 }
 0x2ad   :  { %v503_v6 = vpack.c.bf16 %v848_v5, %v848_v5  ;;  %v850_v9 = vpop.eup %849 }
 0x2af   :  { %794 = vmatmul.mubr.bf16.vlgmr.msra.gmra.mrb[4].mxu1 %v503_v6 }
 0x2d4   :  { %v247_v10 = vpop.xlane.xlu0 %246 }
 0x2d5   :  { %v255_v11 = vmul.f32 %v850_v9, %v247_v10 }
 0x2d8   :  { %v259_v12 = vpop.xlane.xlu0 %258 }
 0x2d9   :  { %v260_v13 = vmax.f32 %v255_v11, %v259_v12 }
 0x2db   :  { %v264_v14 = vsub.f32 %v256_v57, %v260_v13  ;;  %v261_v18 = vsub.f32 %v255_v11, %v260_v13 }
 0x2dd   :  { %v265_v15 = vmul.f32 1.442695, %v264_v14  ;;  %v262_v19 = vmul.f32 1.442695, %v261_v18 }
 0x2df   :  { %851 = vpow2.f32 %v265_v15 }
 0x2e0   :  { %853 = vpow2.f32 %v262_v19 }
 0x2e9   :  { %v852_v16 = vpop.eup %851 }
 0x2ea   :  { %v267_v17 = vsel %vm244_vm1, %v852_v16, 0.0  ;;  %v854_v20 = vpop.eup %853 }
 0x2eb   :  { %268 = vadd.xlane.f32.xlu1 %v267_v17 }
 0x378   :  { %v269_v21 = vpop.xlane.xlu1 %268 }
 0x379   :  { %v270_v23 = vadd.f32 %v854_v20, %v269_v21 }
 0x37b   :  { %855 = vlog2.f32 %v270_v23 }
 0x382   :  { %v609_v26 = vpop.f32.mrb[4].mxu1 }
 0x383   :  { %v610_v27 = vadd.f32 %v693_v25, %v609_v26  ;;  %v795_v28 = vpop.f32.mrb[5].mxu1 }
 0x384   :  { %v612_v29 = vpop.f32.mrb[6].mxu1 }
 0x385   :  { %v796_v30 = vpop.f32.mrb[7].mxu1  ;;  %v618_v31 = vsel %vm617_vm3, %v610_v27, -1e+30  ;;  %v856_v32 = vpop.eup %855 }
 0x386   :  { %619 = vmax.xlane.f32.xlu0 %v618_v31  ;;  %v272_v33 = vmul.f32 0.6931472, %v856_v32 }
 0x388   :  { %v273_v34 = vadd.f32 %v272_v33, %v260_v13 }
 0x38a   :  { %v274_v35 = vsub.f32 %v273_v34, %v255_v11 }
 0x38c   :  { %276 = vst.msk [vmem:[#allocation20] sm:$0xff] %vm275_vm4, %v274_v35 }
 0x39c   :  { %631 = vperm.xlu0 %816, %v629_v36  }
 0x413   :  { %v620_v37 = vpop.xlane.xlu0 %619 }
 0x414   :  { %v621_v38 = vsub.f32 %v618_v31, %v620_v37 }
 0x416   :  { %v622_v39 = vmul.f32 1.442695, %v621_v38 }
 0x418   :  { %857 = vpow2.f32 %v622_v39 }
 0x41b   :  { %v632_v40 = vpop.permute.xlu0 %631 }
 0x41c   :  { %vm633_vm5 = vcmp.eq.s32.totalorder %v616_v24, %v632_v40 }
 0x41d   :  { %v634_v42 = vsel %vm633_vm5, %v618_v31, 0.0 }
 0x422   :  { %v858_v41 = vpop.eup %857 }
 0x423   :  { %624 = vadd.xlane.f32.xlu1 %v858_v41 }
 0x427   :  { %635 = vadd.xlane.f32.xlu1 %v634_v42 }
 0x428   :  { %1114 = shalt.err (!%p1111_p8)
}
 0x429   :  { %s1115_s28 = scalar_lea.hbm %s1465_s11, 128 }
 0x42a   :  { %p1116_p9 = scmp.ne.s32.totalorder %s1465_s11, %s1115_s28  ;;  %p1119_p10 = scmp.lt.u32.totalorder %s1115_s28, %s1465_s11 }
 0x42c   :  { %p1121_p11 = pnand %p1119_p10, %p1116_p9 }
 0x42e   :  { %1124 = shalt.err (!%p1121_p11)
}
 0x42f   :  { %648 = dma.vmem_to_hbm [thread:$0]  %s646_s4, 128, %s1465_s11, [#allocation4]  }
 0x430   :  { %s1180_s18 = smov [#allocation21]  }
 0x431   :  { %s655_s9 = sshll.u32 %s1180_s18, 4  ;;  %s656_s9 = int_to_ptr.vmem [resolvable:$true] %s655_s9 }
 0x432   :  { %s1125_s6 = scalar_lea.vmem %s656_s9, 128  ;;  %p1130_p13 = scmp.lt.s32.totalorder %s656_s9, %s656_s9 }
 0x433   :  { %p1126_p12 = scmp.ne.s32.totalorder %s656_s9, %s1125_s6  ;;  %p1131_p0 = scmp.lt.s32.totalorder %s1125_s6, %s1125_s6 }
 0x435   :  { %p1132_p1 = por %p1131_p0, %p1130_p13 }
 0x437   :  { %p1133_p2 = pnand %p1132_p1, %p1126_p12 }
 0x4b0   :  { %v625_v43 = vpop.xlane.xlu1 %624 }
 0x4b1   :  { %859 = vlog2.f32 %v625_v43 }
 0x4b4   :  { %v636_v47 = vpop.xlane.xlu1 %635 }
 0x4bb   :  { %v860_v44 = vpop.eup %859 }
 0x4bc   :  { %v627_v45 = vmul.f32 0.6931472, %v860_v44 }
 0x4be   :  { %v628_v46 = vadd.f32 %v627_v45, %v620_v37 }
 0x4c0   :  { %v637_v48 = vsub.f32 %v628_v46, %v636_v47 }
 0x4c2   :  { %638 = vst.msk [vmem:[#allocation21] sm:$0xff] %vm275_vm4, %v637_v48 }
 0x4c3   :  { %1136 = shalt.err (!%p1133_p2)
}
 0x4c4   :  { %s1137_s2 = scalar_lea.hbm %s1466_s12, 128 }
 0x4c5   :  { %p1138_p3 = scmp.ne.s32.totalorder %s1466_s12, %s1137_s2  ;;  %p1141_p4 = scmp.lt.u32.totalorder %s1137_s2, %s1466_s12 }
 0x4c7   :  { %p1143_p5 = pnand %p1141_p4, %p1138_p3 }
 0x4c9   :  { %1146 = shalt.err (!%p1143_p5)
}
 0x4ca   :  { %658 = dma.vmem_to_hbm [thread:$0]  %s656_s9, 128, %s1466_s12, [#allocation22]  }
 0x4cb   :  { %1159 = dma.done.wait [#allocation4], 128  }
 0x4cc   :  { %1160 = vsyncadd [#allocation4], 4294967168 }
 0x4cd   :  { %1161 = dma.done.wait [#allocation22], 128  }
 0x4ce   :  { %1162 = vsyncadd [#allocation22], 4294967168 }
 0x4cf   :  { %665 = vsyncpa [#allocation3], 1 }
 0x4d0   :  { %666 = vsyncpa [#allocation6], 1 }
 0x4d1   :  { %667 = vsyncpa [#allocation9], 1 }
 0x4d2   :  { %668 = vsyncpa [#allocation12], 1 }
 0x4d3   :  { %669 = vsyncpa [#allocation15], 1 }
 0x4d4   :  { %670 = vsyncpa [#allocation18], 1 }
 0x4d5   :  { %671 = vsyncpa [#allocation4], 1 }
 0x4d6   :  { %672 = vsyncpa [#allocation22], 1 }

</bundles_post_ra>
